<compile_context>
chip_gen: v7x
topology: tpu7x:2x2x1
jax: 0.10.0
libtpu: 0.0.40
codegen_flags: <defaults>
</compile_context>

<pallas_src>
import math

import jax
import jax.numpy as jnp
from jax.experimental import pallas as pl
from jax.experimental.pallas import tpu as pltpu

_LOG_2PI = math.log(2.0 * math.pi)
_HIGHEST = jax.lax.Precision.HIGHEST


def _round_up(x, m):
    return ((x + m - 1) // m) * m


def _lane_pad(n):
    return _round_up(max(int(n), 1), 128)


# --------------------------------------------------------------------------- #
# Kernel: one batch tile -> [log_prob | state_value]
# --------------------------------------------------------------------------- #
def _evaluate_kernel(var_ref, xa_ref, w_ref, b_ref, out_ref):
    """xa = [state | action] (tb, S+1); w/b is the pre-collapsed fused affine map.

    Column 0 of the matmul result is (action - action_mean) directly (actor
    weights negated, action row of W is 1), column 1 is the critic value.
    """
    inv_var = var_ref[0]                           # SMEM scalars: 1/var, log(var)
    log_var = var_ref[1]
    y = jnp.dot(xa_ref[...], w_ref[...],
                preferred_element_type=jnp.float32) + b_ref[...]
    # y: (tb, 2) -> col 0 = action - action_mean, col 1 = state_value.
    # log_prob below is also (harmlessly) evaluated on the value column; the
    # lane select discards it — do NOT "fix" this into a lane slice.
    log_prob = -0.5 * (y * y * inv_var + (_LOG_2PI + log_var))
    col = jax.lax.broadcasted_iota(jnp.int32, y.shape, 1)
    out_ref[...] = jnp.where(col == 0, log_prob, y)     # [log_prob | value]


# --------------------------------------------------------------------------- #
# Parameter helpers
# --------------------------------------------------------------------------- #
def make_params(key, state_dim, hidden_dim, action_dim):
    """PyTorch-Linear-style init: U(-1/sqrt(fan_in), 1/sqrt(fan_in)).

    Returns (actor_params, critic_params), flat lists [W0, b0, W1, b1, ...]
    with W stored as (in_features, out_features), b as (1, out_features).
    """
    def linear(k, fan_in, fan_out):
        k_w, k_b = jax.random.split(k)
        bound = 1.0 / math.sqrt(fan_in)
        w = jax.random.uniform(k_w, (fan_in, fan_out), jnp.float32, -bound, bound)
        b = jax.random.uniform(k_b, (1, fan_out), jnp.float32, -bound, bound)
        return w, b

    dims_actor = [state_dim] + list(hidden_dim) + [action_dim]
    dims_critic = [state_dim] + list(hidden_dim) + [1]

    actor, critic = [], []
    for i in range(len(dims_actor) - 1):
        key, ka, kc = jax.random.split(key, 3)
        actor.extend(linear(ka, dims_actor[i], dims_actor[i + 1]))
        critic.extend(linear(kc, dims_critic[i], dims_critic[i + 1]))
    return actor, critic


def _collapse_affine(params):
    """Compose an activation-free Linear chain into one (W_eff, b_eff).

    ONLY valid because the reference ActorCritic builds actor/critic as
    nn.Sequential of Linear layers with NO nonlinearities between them.
    """
    w_eff, b_eff = params[0], params[1]
    for i in range(1, len(params) // 2):
        w, b = params[2 * i], params[2 * i + 1]
        w_eff = jnp.dot(w_eff, w, precision=_HIGHEST)
        b_eff = jnp.dot(b_eff, w, precision=_HIGHEST) + b
    return w_eff, b_eff


def _fuse_heads(actor_params, critic_params):
    """Build the (S+1, 2) weight and (1, 2) bias producing [action - mean | value].

    Column 0: [-Wa_eff ; 1]  with bias -ba_eff   (so x_aug @ col0 = action - mean)
    Column 1: [ Wc_eff ; 0]  with bias  bc_eff   (critic value)
    """
    wa, ba = _collapse_affine(actor_params)        # (S, 1), (1, 1)
    wc, bc = _collapse_affine(critic_params)       # (S, 1), (1, 1)
    col0 = jnp.concatenate([-wa, jnp.ones((1, 1), jnp.float32)], axis=0)
    col1 = jnp.concatenate([wc, jnp.zeros((1, 1), jnp.float32)], axis=0)
    w_fused = jnp.concatenate([col0, col1], axis=1)            # (S+1, 2)
    b_fused = jnp.concatenate([-ba, bc], axis=1)               # (1, 2)
    return w_fused, b_fused


# --------------------------------------------------------------------------- #
# Wrapper
# --------------------------------------------------------------------------- #
def actor_critic_evaluate(state, action, actor_params, critic_params, var,
                          *, block_b=8192):
    """Pallas-backed ActorCritic.evaluate(state, action, std_obs) for the
    fixed_std=True, action_dim=1 configuration.

    Returns (action_logprobs (B,), state_value (B,), dist_entropy (B,)).
    `var` may be a Python float or a traced scalar — it is passed to the
    kernel via SMEM, so std-decay updates never force a recompile.
    """
    B, S = state.shape
    if actor_params[-1].shape[1] != 1:
        raise ValueError("fixed_std (1x1-cov MVN) path requires action_dim == 1")

    # Pack action as an extra lane column of state: (B, S+1).
    xa = jnp.concatenate(
        [state.astype(jnp.float32), action.reshape(B, 1).astype(jnp.float32)],
        axis=1)

    # Collapse + fuse actor/critic heads once, outside the kernel.
    w_fused, b_fused = _fuse_heads(actor_params, critic_params)   # (S+1,2),(1,2)

    var = jnp.asarray(var, jnp.float32)
    var_scalars = jnp.stack([1.0 / var, jnp.log(var)])            # SMEM (2,)

    # Batch tiling: biggest tile allowed, but >= 2 grid blocks when B allows so
    # the "parallel" axis shards across v7x's two TensorCores (no-op on v5e/v6e).
    tb = min(block_b, _round_up(B, 8))
    if B > 8:
        tb = min(tb, _round_up(-(-B // 2), 8))
    b_pad = _round_up(B, tb)
    if b_pad != B:
        xa = jnp.pad(xa, ((0, b_pad - B), (0, 0)))
    n_blocks = b_pad // tb

    # VMEM budget: double-buffered, 128-lane-padded input + output tiles + slack.
    vmem_limit = int(2 * tb * (_lane_pad(S + 1) + _lane_pad(2)) * 4 + (2 << 20))
    vmem_limit = min(max(vmem_limit, 4 << 20), 48 << 20)

    flops = 2 * b_pad * (S + 1) * 2 + 8 * b_pad * 2
    bytes_accessed = 4 * (b_pad * (S + 1) + b_pad * 2
                          + w_fused.size + b_fused.size + 2)

    out = pl.pallas_call(
        _evaluate_kernel,
        out_shape=jax.ShapeDtypeStruct((b_pad, 2), jnp.float32),
        grid_spec=pltpu.PrefetchScalarGridSpec(
            num_scalar_prefetch=0,
            grid=(n_blocks,),
            in_specs=[
                pl.BlockSpec(memory_space=pltpu.MemorySpace.SMEM),   # [1/var, log var]
                pl.BlockSpec((tb, S + 1), lambda i: (i, 0)),         # [state | action]
                pl.BlockSpec((S + 1, 2), lambda i: (0, 0)),          # fused weight
                pl.BlockSpec((1, 2), lambda i: (0, 0)),              # fused bias
            ],
            out_specs=pl.BlockSpec((tb, 2), lambda i: (i, 0)),
        ),
        compiler_params=pltpu.CompilerParams(
            dimension_semantics=("parallel",),
            vmem_limit_bytes=vmem_limit),
        cost_estimate=pl.CostEstimate(flops=flops, transcendentals=0,
                                      bytes_accessed=bytes_accessed),
    )(var_scalars, xa, w_fused, b_fused)

    action_logprobs = out[:B, 0]
    state_value = out[:B, 1]
    # Entropy of a fixed-covariance 1x1 MVN is data-independent.
    dist_entropy = jnp.broadcast_to(
        0.5 * (_LOG_2PI + 1.0 + jnp.log(var)), (B,)).astype(jnp.float32)
    return action_logprobs, state_value, dist_entropy


# --------------------------------------------------------------------------- #
# Plain-JAX reference (for correctness checking)
# --------------------------------------------------------------------------- #
def _reference(state, action, actor_params, critic_params, var):
    def mlp(x, params):
        for i in range(0, len(params), 2):
            x = jnp.dot(x, params[i], precision=_HIGHEST) + params[i + 1]
        return x

    mean = mlp(state, actor_params)                       # (B, 1)
    value = mlp(state, critic_params)[:, 0]               # (B,)
    a = action.reshape(-1, 1)
    logprob = (-0.5 * ((a - mean) ** 2 / var + _LOG_2PI + math.log(var)))[:, 0]
    entropy = jnp.broadcast_to(
        0.5 * (_LOG_2PI + 1.0 + math.log(var)), (state.shape[0],)).astype(jnp.float32)
    return logprob, value, entropy


if __name__ == "__main__":
    # Small shapes consistent with the module: flat states, MLP actor/critic.
    state_dim = 16
    action_dim = 1          # required by the fixed_std (1x1-covariance MVN) path
    hidden_dim = [32, 32]
    init_std = 0.02
    var = init_std * init_std   # StdDecay.set_std with fixed_std=True -> init_std**2

    key = jax.random.PRNGKey(0)
    k_params, k_data = jax.random.split(key)
    actor_params, critic_params = make_params(k_params, state_dim, hidden_dim, action_dim)

    ok = True
    # Case 1: tiny batch (single tile).  Case 2: ragged batch, small tile ->
    # multi-block grid + padding path.  Case 3: larger batch, default tile ->
    # >=2 blocks for the megacore path.
    for batch, block_b in ((8, 8192), (50, 16), (1000, 8192)):
        ks, ka = jax.random.split(jax.random.fold_in(k_data, batch))
        state = jax.random.normal(ks, (batch, state_dim), jnp.float32)
        action = jax.random.normal(ka, (batch,), jnp.float32) * init_std

        logprob, value, entropy = actor_critic_evaluate(
            state, action, actor_params, critic_params, var, block_b=block_b)
        jax.block_until_ready((logprob, value, entropy))

        ref_lp, ref_v, ref_e = _reference(state, action, actor_params,
                                          critic_params, var)
        ok &= bool(jnp.allclose(logprob, ref_lp, atol=2e-3, rtol=1e-4))
        ok &= bool(jnp.allclose(value, ref_v, atol=1e-4, rtol=1e-4))
        ok &= bool(jnp.allclose(entropy, ref_e, atol=1e-5, rtol=1e-5))

    # TODO(synk): act()'s dist.sample() (random action sampling) and StdDecay's
    # host-side bookkeeping are left outside the kernel; only the deterministic
    # evaluate() math is implemented here.
    assert ok
    print("KERNEL_OK")
</pallas_src>

<mosaic_0001>
module attributes {stable_mosaic.version = 11 : i64} {
  func.func @_evaluate_kernel(%arg0: i32, %arg1: memref<2xf32, #tpu.memory_space<smem>>, %arg2: memref<8x17xf32, #tpu.memory_space<vmem>>, %arg3: memref<17x2xf32, #tpu.memory_space<vmem>>, %arg4: memref<1x2xf32, #tpu.memory_space<vmem>>, %arg5: memref<8x2xf32, #tpu.memory_space<vmem>>) attributes {dimension_semantics = [#tpu.dimension_semantics<parallel>], iteration_bounds = array<i64: 1>, scalar_prefetch = 0 : i64, scratch_operands = 0 : i64, tpu.core_type = #tpu.core_type<tc>, window_params = [{transform_indices = @transform_0, window_bounds = array<i64: 2>}, {transform_indices = @transform_1, window_bounds = array<i64: 8, 17>}, {pipeline_mode = #tpu.pipeline_mode<synchronous>, transform_indices = @transform_2, window_bounds = array<i64: 17, 2>}, {pipeline_mode = #tpu.pipeline_mode<synchronous>, transform_indices = @transform_3, window_bounds = array<i64: 1, 2>}, {transform_indices = @transform_4, window_bounds = array<i64: 8, 2>}]} {
    %c0 = arith.constant 0 : index
    %0 = memref.load %arg1[%c0] : memref<2xf32, #tpu.memory_space<smem>>
    %c1 = arith.constant 1 : index
    %1 = memref.load %arg1[%c1] : memref<2xf32, #tpu.memory_space<smem>>
    %c0_0 = arith.constant 0 : index
    %c0_1 = arith.constant 0 : index
    %2 = vector.load %arg2[%c0_0, %c0_1] : memref<8x17xf32, #tpu.memory_space<vmem>>, vector<8x17xf32>
    %c0_2 = arith.constant 0 : index
    %c0_3 = arith.constant 0 : index
    %3 = vector.load %arg3[%c0_2, %c0_3] : memref<17x2xf32, #tpu.memory_space<vmem>>, vector<17x2xf32>
    %cst = arith.constant dense<0.000000e+00> : vector<8x2xf32>
    %4 = tpu.matmul %2, %3, %cst {dimension_numbers = #tpu.dot_dimension_numbers<[1], [0], [0], [1], [0, 0, 1, 1], [], []>} : vector<8x17xf32>, vector<17x2xf32>, vector<8x2xf32> -> vector<8x2xf32>
    %c0_4 = arith.constant 0 : index
    %c0_5 = arith.constant 0 : index
    %5 = vector.load %arg4[%c0_4, %c0_5] : memref<1x2xf32, #tpu.memory_space<vmem>>, vector<1x2xf32>
    %6 = vector.broadcast %5 : vector<1x2xf32> to vector<8x2xf32>
    %7 = arith.addf %4, %6 : vector<8x2xf32>
    %8 = arith.mulf %7, %7 : vector<8x2xf32>
    %9 = vector.broadcast %0 : f32 to vector<8x2xf32>
    %10 = arith.mulf %8, %9 : vector<8x2xf32>
    %cst_6 = arith.constant 1.83787704 : f32
    %11 = arith.addf %cst_6, %1 : f32
    %12 = vector.broadcast %11 : f32 to vector<8x2xf32>
    %13 = arith.addf %10, %12 : vector<8x2xf32>
    %cst_7 = arith.constant -5.000000e-01 : f32
    %14 = vector.broadcast %cst_7 : f32 to vector<8x2xf32>
    %15 = arith.mulf %14, %13 : vector<8x2xf32>
    %16 = tpu.iota {dimensions = array<i32: 1>} : vector<8x2xi32>
    %c0_i32 = arith.constant 0 : i32
    %17 = vector.broadcast %c0_i32 : i32 to vector<8x2xi32>
    %18 = arith.cmpi eq, %16, %17 : vector<8x2xi32>
    %19 = arith.select %18, %15, %7 : vector<8x2xi1>, vector<8x2xf32>
    %c0_8 = arith.constant 0 : index
    %c0_9 = arith.constant 0 : index
    %20 = vector.load %arg5[%c0_8, %c0_9] : memref<8x2xf32, #tpu.memory_space<vmem>>, vector<8x2xf32>
    tpu.vector_store %arg5[%c0_8, %c0_9], %19 {strides = array<i32>} : memref<8x2xf32, #tpu.memory_space<vmem>>, vector<8x2xf32>,
    return
  }
  func.func @transform_0(%arg0: i32) -> i32 {
    %c0_i32 = arith.constant 0 : i32
    %c0_i32_0 = arith.constant 0 : i32
    return %c0_i32 : i32
  }
  func.func @transform_1(%arg0: i32) -> (i32, i32) {
    %c0_i32 = arith.constant 0 : i32
    %c0_i32_0 = arith.constant 0 : i32
    return %arg0, %c0_i32 : i32, i32
  }
  func.func @transform_2(%arg0: i32) -> (i32, i32) {
    %c0_i32 = arith.constant 0 : i32
    %c0_i32_0 = arith.constant 0 : i32
    %c0_i32_1 = arith.constant 0 : i32
    return %c0_i32, %c0_i32_0 : i32, i32
  }
  func.func @transform_3(%arg0: i32) -> (i32, i32) {
    %c0_i32 = arith.constant 0 : i32
    %c0_i32_0 = arith.constant 0 : i32
    %c0_i32_1 = arith.constant 0 : i32
    return %c0_i32, %c0_i32_0 : i32, i32
  }
  func.func @transform_4(%arg0: i32) -> (i32, i32) {
    %c0_i32 = arith.constant 0 : i32
    %c0_i32_0 = arith.constant 0 : i32
    return %arg0, %c0_i32 : i32, i32
  }
}

</mosaic_0001>

<bundles_post_ra>
// kernel: tpu_custom_call.1
= control target key start
LH: loop header
LB: loop body
LE: loop exit
PB: predicated region body
PF: predicated region fallthrough
CT: control target
= control target key end

     0   :  { %9 = vsyncpa [#allocation3], 0  ;;  %s227_s0 = inlined_call_operand.vmem [shape: f32[2], index: 0, kind: input, shape index: {}]   ;;  %s228_s1 = inlined_call_operand.vmem [shape: f32[8,17], index: 1, kind: input, shape index: {}]   ;;  %s229_s2 = inlined_call_operand.vmem [shape: f32[17,2], index: 2, kind: input, shape index: {}]   ;;  %s230_s3 = inlined_call_operand.vmem [shape: f32[1,2], index: 3, kind: input, shape index: {}]   ;;  %s231_s4 = inlined_call_operand.vmem [shape: f32[8,2], index: 4, kind: output, shape index: {}]  }
   0x1   :  { %s16_s17 = sshll.u32 %s227_s0, 4  ;;  %s17_s17 = int_to_ptr.vmem [resolvable:$true] %s16_s17 }
   0x2   :  { %s163_s18 = scalar_lea.vmem %s17_s17, 16  ;;  %p168_p1 = scmp.lt.s32.totalorder %s17_s17, %s17_s17 }
   0x3   :  { %p164_p0 = scmp.ne.s32.totalorder %s17_s17, %s163_s18  ;;  %p169_p2 = scmp.lt.s32.totalorder %s163_s18, %s163_s18 }
   0x5   :  { %p170_p3 = por %p169_p2, %p168_p1 }
   0x7   :  { %p171_p4 = pnand %p170_p3, %p164_p0 }
   0x9   :  { %174 = shalt.err (!%p171_p4)
}
   0xa   :  { %s177_s19 = smov [#allocation2]  }
   0xb   :  { %19 = dma.vmem_to_smem %s17_s17, 16, %s177_s19, [#allocation3]  }
   0xc   :  { %175 = dma.done.wait [#allocation3], 16  }
   0xd   :  { %176 = vsyncadd [#allocation3], 4294967280 }
   0xe   :  { %29 = sfence }
   0xf   :  { %v33_v0 = vld [vmem:[%s229_s2] sm:$0xff]  ;;  %v34_v1 = vld [vmem:[%s229_s2 + $0x8] sm:$0xff]  ;;  %v178_v2 = vmov 0.0|0.0   ;;  %vm179_vm0 = vmmov 0   ;;  %v180_v4 = vmov 0.0   ;;  %vm47_vm1 = vcmask 1040384  }
  0x10   :  { %156 = vmatprep.subr.bf16.mxu0 %v178_v2  ;;  %v157_v3 = vpack.c.bf16 %v34_v1, %v33_v0  ;;  %153 = vmatprep.mubr.msk.f32.mxu0 %vm179_vm0, %v180_v4  ;;  %v35_v5 = vld [vmem:[%s229_s2 + $0x10] sm:$0x1]  ;;  %v32_v6 = vld [vmem:[%s228_s1] sm:$0xff]  ;;  %vm43_vm2 = vcmask 138240   ;;  %s139_s27 = sld [smem:[#allocation2 + $0x1]]  ;;  %s30_s28 = sld [smem:[#allocation2]]  ;;  %v128_v9 = vlaneseq }
  0x11   :  { %v140_v7 = vld [vmem:[%s230_s3] ss:$0 sm:$0xff]  ;;  %vm132_vm4 = vcmask 15360  }
  0x12   :  { %158 = vmatpush3.bf16.msra.mxu0 %v157_v3  ;;  %v129_v15 = vand.u32 127, %v128_v9 }
  0x13   :  { %151 = vmatprep.subr.mxu0 %v180_v4 }
  0x14   :  { %vm130_vm3 = vcmp.eq.s32.totalorder %v129_v15, 0 }
  0x16   :  { %152 = vmatpush3.msk.msra.mxu0 %vm47_vm1, %v35_v5  ;;  %s124_s5 = sadd.f32 1.837877, %s139_s27  ;;  %v122_v12 = vstv %s30_s28 }
  0x17   :  { %154 = vmatmul.mubr.msk.f32.vlgmr.msra.gmra.mrb[0].mxu0 %vm43_vm2, %v32_v6 }
  0x18   :  { %v125_v14 = vstv %s124_s5 }
  0xea   :  { %v117_v8 = vpop.f32.mrb[0].mxu0 }
  0xeb   :  { %v118_v10 = vadd.f32 %v140_v7, %v117_v8  ;;  %v155_v11 = vpop.f32.mrb[1].mxu0 }
  0xed   :  { %v121_v13 = vmul.f32 %v118_v10, %v118_v10 }
  0xef   :  { %v123_v16 = vmul.f32 %v122_v12, %v121_v13 }
  0xf1   :  { %v126_v17 = vadd.f32 %v125_v14, %v123_v16 }
  0xf3   :  { %v127_v18 = vmul.f32 -0.5, %v126_v17 }
  0xf5   :  { %v131_v19 = vsel %vm130_vm3, %v127_v18, %v118_v10 }
  0xf6   :  { %133 = vst.msk [vmem:[%s231_s4] sm:$0xff] %vm132_vm4, %v131_v19 }
  0xf7   :  { %138 = vsyncpa [#allocation3], 1 }

</bundles_post_ra>
